<compile_context>
chip_gen: v7x
topology: tpu7x:2x2x1
jax: 0.10.0
libtpu: 0.0.40
codegen_flags: <defaults>
</compile_context>

<pallas_src>
import jax
import jax.numpy as jnp
from jax import lax
from jax.experimental import pallas as pl
from jax.experimental.pallas import tpu as pltpu


def attn_kernel(x_ref, w_ref, b_ref, o_ref):
    # x_ref: (TB, T, H) VMEM block for TB batch elements
    # w_ref: (1, H)     VMEM, grid-invariant Linear(H, 1) weight (f32)
    # b_ref: (1, 1)     VMEM, grid-invariant bias (f32)
    # o_ref: (TB, H)    VMEM output block
    x = x_ref[...]                                   # (TB, T, H)
    w = w_ref[...].astype(x.dtype)                   # (1, H)

    # Linear(H -> 1): broadcast-multiply + lane reduce over H, f32 accumulation.
    # Result is lane-major (TB, T): T sits on the lane axis.
    # TODO(synk): for very large H, switch to an MXU dot ((TB*T,H)@(H,1)) or a
    # chunked H reduction if the broadcast-multiply does not fuse into the lane
    # reduce (the possible (TB,T,H) temporary is accounted for in vmem sizing).
    scores = jnp.sum(x * w, axis=-1, dtype=jnp.float32) + b_ref[...]   # (TB, T)
    scores = jnp.tanh(scores)

    # Softmax over T (lane axis).  tanh bounds the logits to [-1, 1], so exp
    # cannot overflow and the usual max-subtraction is unnecessary (exact math
    # is unchanged; one cross-lane max saved).
    e = jnp.exp(scores)                              # (TB, T)
    denom = jnp.sum(e, axis=-1, keepdims=True)       # (TB, 1)
    att = e / denom                                  # exact normalization

    # Weighted reduction over T on the MXU: (TB,1,T) x (TB,T,H) -> (TB,1,H).
    # HIGHEST precision keeps f32 inputs exact (FLOPs are negligible vs. DMA).
    out = jnp.einsum(
        "bqt,bth->bqh",
        att[:, None, :].astype(x.dtype), x,
        preferred_element_type=jnp.float32,
        precision=lax.Precision.HIGHEST,
    )
    o_ref[...] = out[:, 0, :].astype(o_ref.dtype)    # (TB, H)


def _choose_block_b(B, T, H, itemsize, budget_bytes=4 * 1024 * 1024, min_blocks=2):
    """Per-step batch tile.

    Priorities: x tile <= budget_bytes; >= `min_blocks` grid steps when B allows
    (so both v7x TensorCores get work from the 'parallel' axis); block_b a
    multiple of 8 (sublane-aligned output block) that ideally divides B.
    """
    bytes_per_row = T * H * itemsize
    rows_budget = max(1, budget_bytes // bytes_per_row)
    if B <= 8:
        return B                                  # tiny batch: single step
    cap = min(rows_budget, B)
    if cap < 8:
        # TODO(synk): a single (1, T, H) row exceeds the budget; needs a T grid
        # axis with an online-softmax accumulator.  Fall back to the minimum
        # sublane-aligned block; vmem_limit below is sized from the real tile.
        return 8
    cap = (cap // 8) * 8
    if B > 8 * min_blocks:
        # Leave at least `min_blocks` blocks for megacore sharding on v7x.
        cap = min(cap, max(8, (pl.cdiv(B, min_blocks) // 8) * 8))
    # Prefer a block size that divides B evenly (balanced, no padded tail).
    for bb in range(cap, 7, -8):
        if B % bb == 0:
            return bb
    return cap


def attn_forward(x, w, b, *, block_b=None):
    """x: (B, T, H), w: (1, H), b: (1, 1) or (1,)  ->  (B, H)."""
    B, T, H = x.shape
    itemsize = jnp.dtype(x.dtype).itemsize
    if block_b is None:
        block_b = _choose_block_b(B, T, H, itemsize)
    grid_b = pl.cdiv(B, block_b)

    w_arr = jnp.asarray(w, dtype=jnp.float32).reshape(1, H)
    b_arr = jnp.asarray(b, dtype=jnp.float32).reshape(1, 1)

    # VMEM budget from the actual tiles: 2x double-buffered x + one in-kernel
    # (TB,T,H) temporary (x*w product) + 2x output + slack.  With the <=4 MiB
    # tile budget this stays well under v7x's 64 MiB physical VMEM and above
    # v5e's 16 MiB default scoped limit.
    x_tile = block_b * T * H * itemsize
    out_tile = block_b * H * itemsize
    vmem_need = 3 * x_tile + 2 * out_tile + (2 << 20)
    vmem_limit = int(min(max(vmem_need, 32 << 20), 100 << 20))

    # NOTE: the output is lane-dense when H is a multiple of 128; in real
    # deployments pad H in HBM if needed (biggest single store-side lever).
    return pl.pallas_call(
        attn_kernel,
        out_shape=jax.ShapeDtypeStruct((B, H), x.dtype),
        grid_spec=pltpu.PrefetchScalarGridSpec(
            num_scalar_prefetch=0,
            grid=(grid_b,),
            in_specs=[
                pl.BlockSpec((block_b, T, H), lambda i: (i, 0, 0)),
                pl.BlockSpec((1, H), lambda i: (0, 0)),
                pl.BlockSpec((1, 1), lambda i: (0, 0)),
            ],
            out_specs=pl.BlockSpec((block_b, H), lambda i: (i, 0)),
        ),
        compiler_params=pltpu.CompilerParams(
            dimension_semantics=("parallel",),
            vmem_limit_bytes=vmem_limit,
        ),
    )(x, w_arr, b_arr)


def attn_reference(x, w, b):
    b0 = jnp.asarray(b, jnp.float32).reshape(())
    scores = jnp.tanh(
        jnp.einsum("bth,oh->bto", x, w, precision=lax.Precision.HIGHEST) + b0
    )                                                # (B, T, 1)
    att = jax.nn.softmax(scores, axis=1)
    return jnp.sum(att * x, axis=1)                  # (B, H)


if __name__ == "__main__":
    B, T, H = 2, 8, 32  # batch, seq, hidden

    key = jax.random.PRNGKey(0)
    kx, kw, kb = jax.random.split(key, 3)

    x = jax.random.normal(kx, (B, T, H), dtype=jnp.float32)
    # nn.Linear(hidden_size, 1): weight (1, H), bias (1,)
    w = jax.random.normal(kw, (1, H), dtype=jnp.float32) * 0.1
    b = jax.random.normal(kb, (1, 1), dtype=jnp.float32) * 0.1

    out = jax.block_until_ready(attn_forward(x, w, b))
    ref = attn_reference(x, w, b)

    assert out.shape == (B, H)
    err = jnp.max(jnp.abs(out - ref))
    assert jnp.allclose(out, ref, atol=1e-4, rtol=1e-4), float(err)

    print("KERNEL_OK")
</pallas_src>

<mosaic_0001>
module attributes {stable_mosaic.version = 11 : i64} {
  func.func @attn_kernel(%arg0: i32, %arg1: memref<2x8x32xf32, #tpu.memory_space<vmem>>, %arg2: memref<1x32xf32, #tpu.memory_space<vmem>>, %arg3: memref<1x1xf32, #tpu.memory_space<vmem>>, %arg4: memref<2x32xf32, #tpu.memory_space<vmem>>) attributes {dimension_semantics = [#tpu.dimension_semantics<parallel>], iteration_bounds = array<i64: 1>, scalar_prefetch = 0 : i64, scratch_operands = 0 : i64, tpu.core_type = #tpu.core_type<tc>, window_params = [{transform_indices = @transform_0, window_bounds = array<i64: 2, 8, 32>}, {pipeline_mode = #tpu.pipeline_mode<synchronous>, transform_indices = @transform_1, window_bounds = array<i64: 1, 32>}, {pipeline_mode = #tpu.pipeline_mode<synchronous>, transform_indices = @transform_2, window_bounds = array<i64: 1, 1>}, {transform_indices = @transform_3, window_bounds = array<i64: 2, 32>}]} {
    %c0 = arith.constant 0 : index
    %c0_0 = arith.constant 0 : index
    %c0_1 = arith.constant 0 : index
    %0 = vector.load %arg1[%c0, %c0_0, %c0_1] : memref<2x8x32xf32, #tpu.memory_space<vmem>>, vector<2x8x32xf32>
    %c0_2 = arith.constant 0 : index
    %c0_3 = arith.constant 0 : index
    %1 = vector.load %arg2[%c0_2, %c0_3] : memref<1x32xf32, #tpu.memory_space<vmem>>, vector<1x32xf32>
    %2 = vector.shape_cast %1 : vector<1x32xf32> to vector<1x1x32xf32>
    %3 = vector.broadcast %2 : vector<1x1x32xf32> to vector<2x8x32xf32>
    %4 = arith.mulf %0, %3 : vector<2x8x32xf32>
    %cst = arith.constant dense<0.000000e+00> : vector<2x8xf32>
    %5 = vector.multi_reduction <add>, %4, %cst [2] : vector<2x8x32xf32> to vector<2x8xf32>
    %c0_4 = arith.constant 0 : index
    %c0_5 = arith.constant 0 : index
    %6 = vector.load %arg3[%c0_4, %c0_5] : memref<1x1xf32, #tpu.memory_space<vmem>>, vector<1x1xf32>
    %7 = vector.broadcast %6 : vector<1x1xf32> to vector<2x8xf32>
    %8 = arith.addf %5, %7 : vector<2x8xf32>
    %9 = math.tanh %8 : vector<2x8xf32>
    %10 = math.exp %9 : vector<2x8xf32>
    %cst_6 = arith.constant dense<0.000000e+00> : vector<2xf32>
    %11 = vector.multi_reduction <add>, %10, %cst_6 [1] : vector<2x8xf32> to vector<2xf32>
    %12 = vector.shape_cast %11 : vector<2xf32> to vector<2x1xf32>
    %13 = vector.broadcast %12 : vector<2x1xf32> to vector<2x8xf32>
    %14 = arith.divf %10, %13 : vector<2x8xf32>
    %15 = vector.shape_cast %14 : vector<2x8xf32> to vector<2x1x8xf32>
    "tpu.trace_start"() <{level = 10 : i32, message = "bqt,bth->bqh"}> : () -> ()
    %cst_7 = arith.constant dense<0.000000e+00> : vector<2x1x32xf32>
    %16 = tpu.matmul %15, %0, %cst_7 {dimension_numbers = #tpu.dot_dimension_numbers<[2], [1], [1], [2], [0, 0, 0, 1, 1, 2], [0], [0]>, precision = #tpu.contract_precision<fp32>} : vector<2x1x8xf32>, vector<2x8x32xf32>, vector<2x1x32xf32> -> vector<2x1x32xf32>
    "tpu.trace_stop"() : () -> ()
    %17 = vector.shape_cast %16 : vector<2x1x32xf32> to vector<2x32xf32>
    %c0_8 = arith.constant 0 : index
    %c0_9 = arith.constant 0 : index
    %18 = vector.load %arg4[%c0_8, %c0_9] : memref<2x32xf32, #tpu.memory_space<vmem>>, vector<2x32xf32>
    tpu.vector_store %arg4[%c0_8, %c0_9], %17 {strides = array<i32>} : memref<2x32xf32, #tpu.memory_space<vmem>>, vector<2x32xf32>,
    return
  }
  func.func @transform_0(%arg0: i32) -> (i32, i32, i32) {
    %c0_i32 = arith.constant 0 : i32
    %c0_i32_0 = arith.constant 0 : i32
    %c0_i32_1 = arith.constant 0 : i32
    return %arg0, %c0_i32, %c0_i32_0 : i32, i32, i32
  }
  func.func @transform_1(%arg0: i32) -> (i32, i32) {
    %c0_i32 = arith.constant 0 : i32
    %c0_i32_0 = arith.constant 0 : i32
    %c0_i32_1 = arith.constant 0 : i32
    return %c0_i32, %c0_i32_0 : i32, i32
  }
  func.func @transform_2(%arg0: i32) -> (i32, i32) {
    %c0_i32 = arith.constant 0 : i32
    %c0_i32_0 = arith.constant 0 : i32
    %c0_i32_1 = arith.constant 0 : i32
    return %c0_i32, %c0_i32_0 : i32, i32
  }
  func.func @transform_3(%arg0: i32) -> (i32, i32) {
    %c0_i32 = arith.constant 0 : i32
    %c0_i32_0 = arith.constant 0 : i32
    return %arg0, %c0_i32 : i32, i32
  }
}

</mosaic_0001>

<bundles_post_ra>
// kernel: tpu_custom_call.1
= control target key start
LH: loop header
LB: loop body
LE: loop exit
PB: predicated region body
PF: predicated region fallthrough
CT: control target
= control target key end

     0   :  { %s1323_s0 = inlined_call_operand.hbm [shape: f32[2,8,32], index: 0, kind: input, shape index: {}]   ;;  %s1324_s1 = inlined_call_operand.vmem [shape: f32[1,32], index: 1, kind: input, shape index: {}]   ;;  %s1325_s2 = inlined_call_operand.<no memory space> [shape: f32[1,1], index: 2, kind: input, shape index: {}]   ;;  %s1326_s3 = inlined_call_operand.hbm [shape: f32[2,32], index: 3, kind: output, shape index: {}]  }
   0x1   :  { %v8_v0 = vstv %s1325_s2 }
   0x2   :  { %9 = vst [vmem:[#allocation2] sm:$0x1] %v8_v0 }
   0x3   :  { %10 = vsyncpa [#allocation4], 0 }
   0x4   :  { %11 = vsyncpa [#allocation5], 0  ;;  %s1211_s14 = smov [#allocation3]   ;;  %s1163_s18 = scalar_lea.hbm %s1323_s0, 256 }
   0x5   :  { %s17_s15 = sshll.u32 %s1211_s14, 4  ;;  %p1164_p0 = scmp.ne.s32.totalorder %s1323_s0, %s1163_s18  ;;  %s18_s15 = int_to_ptr.vmem [resolvable:$true] %s17_s15 }
   0x6   :  { %p1167_p1 = scmp.lt.u32.totalorder %s1163_s18, %s1323_s0 }
   0x8   :  { %p1169_p2 = pnand %p1167_p1, %p1164_p0 }
   0xa   :  { %1172 = shalt.err (!%p1169_p2)
}
   0xb   :  { %s1173_s2 = scalar_lea.vmem %s18_s15, 256  ;;  %p1178_p4 = scmp.lt.s32.totalorder %s18_s15, %s18_s15 }
   0xc   :  { %p1174_p3 = scmp.ne.s32.totalorder %s18_s15, %s1173_s2  ;;  %p1179_p5 = scmp.lt.s32.totalorder %s1173_s2, %s1173_s2 }
   0xe   :  { %p1180_p6 = por %p1179_p5, %p1178_p4 }
  0x10   :  { %p1181_p7 = pnand %p1180_p6, %p1174_p3 }
  0x12   :  { %1184 = shalt.err (!%p1181_p7)
}
  0x13   :  { %s1212_s23 = smov 128   ;;  %s1213_s24 = smov 8  }
  0x14   :  { %23 = dma.hbm_to_vmem [thread:$0]  %s1323_s0, 256, %s18_s15, [#allocation4], %s1212_s23, %s1212_s23, %s1213_s24  }
  0x15   :  { %1207 = dma.done.wait [#allocation4], 256  }
  0x16   :  { %1208 = vsyncadd [#allocation4], 4294967040  ;;  %v1214_v1 = vmov 0   ;;  %v1253_v2 = vld [vmem:[#allocation3] sm:$0xff]  ;;  %v1036_v3 = vld [vmem:[%s1324_s1] ss:$0 sm:$0xff]  ;;  %v69_v19 = vlaneseq }
  0x17   :  { %1149 = vset.pattern.permute.xlu1 %v1214_v1  ;;  %1150 = vset.pattern.permute.xlu0 %v1214_v1  ;;  %vm42_vm0 = vcmask 261120   ;;  %v32_v4 = vld [vmem:[#allocation3 + $0x8] sm:$0xff]  ;;  %v40_v5 = vmul.f32 %v1036_v3, %v1253_v2  ;;  %v1037_v7 = vld [vmem:[#allocation2] ss:$0 sm:$0xff]  ;;  %vm79_vm1 = vcmask 1041409   ;;  %vm82_vm2 = vcmask 58368  }
  0x18   :  { %v41_v6 = vmul.f32 %v1036_v3, %v32_v4  ;;  %56 = vperm.xlu1 %1149, %v1037_v7   ;;  %v70_v20 = vand.u32 127, %v69_v19  ;;  %v72_v21 = vshrl.u32 %v69_v19, 7  ;;  %v1261_v38 = vand.u32 4294901760, %v1253_v2  ;;  %s1217_s0 = smov [#allocation6]  }
  0x19   :  { %v43_v8 = vsel %vm42_vm0, %v40_v5, 0.0  ;;  %v1263_v39 = vand.u32 4294901760, %v32_v4  ;;  %v1215_v40 = vmov 0.0   ;;  %vm1216_vm3 = vmmov 0   ;;  %s1027_s1 = sshll.u32 %s1217_s0, 4  ;;  %s1028_s1 = int_to_ptr.vmem [resolvable:$true] %s1027_s1 }
  0x1a   :  { %44 = vadd.xlane.f32.xlu0 %v43_v8  ;;  %v46_v9 = vsel %vm42_vm0, %v41_v6, 0.0  ;;  %v73_v22 = vsub.s32 %v70_v20, %v72_v21  ;;  %v89_v29 = vsub.s32 0, %v72_v21  ;;  %v93_v30 = vsub.s32 1, %v72_v21  ;;  %1092 = vmatprep.subr.mxu1 %v1215_v40  ;;  %s1185_s29 = scalar_lea.vmem %s1028_s1, 32  ;;  %p1190_p9 = scmp.lt.s32.totalorder %s1028_s1, %s1028_s1 }
  0x1b   :  { %1062 = vmatprep.subr.mxu0 %v1215_v40  ;;  %1093 = vmatpush3.msra.mxu1 %v1263_v39  ;;  %v190_v41 = vsub.f32 %v1253_v2, %v1261_v38  ;;  %v646_v42 = vsub.f32 %v32_v4, %v1263_v39  ;;  %vm109_vm4 = vcmask 64512   ;;  %vm1019_vm5 = vcmask 254976   ;;  %p1186_p8 = scmp.ne.s32.totalorder %s1028_s1, %s1185_s29  ;;  %p1191_p10 = scmp.lt.s32.totalorder %s1185_s29, %s1185_s29 }
  0x1c   :  { %1063 = vmatpush3.msra.mxu0 %v1261_v38  ;;  %1064 = vmatprep.mubr.msk.f32.mxu0 %vm1216_vm3, %v1215_v40 }
  0x1d   :  { %1094 = vmatprep.mubr.msk.f32.mxu1 %vm1216_vm3, %v1215_v40  ;;  %1097 = vmatprep.subr.mxu1 %v1215_v40  ;;  %v191_v48 = vand.u32 4294901760, %v190_v41  ;;  %v647_v51 = vand.u32 4294901760, %v646_v42  ;;  %p1192_p11 = por %p1191_p10, %p1190_p9 }
  0x1e   :  { %47 = vadd.xlane.f32.xlu0 %v46_v9  ;;  %1067 = vmatprep.subr.mxu0 %v1215_v40 }
  0x1f   :  { %v192_v55 = vsub.f32 %v190_v41, %v191_v48  ;;  %v648_v57 = vsub.f32 %v646_v42, %v647_v51  ;;  %p1193_p12 = pnand %p1192_p11, %p1186_p8 }
  0x21   :  { %v193_v61 = vand.u32 4294901760, %v192_v55  ;;  %v649_v63 = vand.u32 4294901760, %v648_v57 }
  0x97   :  { %v57_v10 = vpop.permute.xlu1 %56 }
  0xa7   :  { %v45_v11 = vpop.xlane.xlu0 %44 }
  0xa8   :  { %v59_v12 = vadd.f32 %v57_v10, %v45_v11 }
  0xaa   :  { %1151 = vtanh.f32 %v59_v12 }
  0xab   :  { %v48_v13 = vpop.xlane.xlu0 %47 }
  0xac   :  { %v60_v14 = vadd.f32 %v57_v10, %v48_v13 }
  0xae   :  { %1153 = vtanh.f32 %v60_v14 }
  0xb4   :  { %v1152_v15 = vpop.eup %1151 }
  0xb5   :  { %v63_v16 = vmul.f32 1.442695, %v1152_v15 }
  0xb7   :  { %1155 = vpow2.f32 %v63_v16 }
  0xb8   :  { %v1154_v17 = vpop.eup %1153 }
  0xb9   :  { %v65_v18 = vmul.f32 1.442695, %v1154_v17 }
  0xbb   :  { %1157 = vpow2.f32 %v65_v18 }
  0xc1   :  { %v1156_v23 = vpop.eup %1155 }
  0xc2   :  { %v74_v25 = vrot.slane %v1156_v23, %v73_v22 }
  0xc5   :  { %v1158_v24 = vpop.eup %1157 }
  0xc6   :  { %v78_v26 = vrot.slane %v1158_v24, %v73_v22 }
  0xc8   :  { %v80_v27 = vsel %vm79_vm1, %v78_v26, %v74_v25 }
  0xc9   :  { %v83_v28 = vsel %vm82_vm2, %v80_v27, 0.0 }
  0xca   :  { %84 = vadd.xlane.f32.xlu1 %v83_v28 }
 0x157   :  { %v85_v31 = vpop.xlane.xlu1 %84 }
 0x158   :  { %v90_v32 = vrot.slane %v85_v31, %v89_v29  ;;  %v94_v33 = vrot.slane %v85_v31, %v93_v30 }
 0x15a   :  { %1159 = vrcp.f32 %v90_v32 }
 0x15b   :  { %1161 = vrcp.f32 %v94_v33 }
 0x164   :  { %v1160_v34 = vpop.eup %1159 }
 0x165   :  { %v1162_v35 = vpop.eup %1161  ;;  %v98_v36 = vmul.f32 %v1160_v34, %v1156_v23 }
 0x166   :  { %v100_v37 = vmul.f32 %v1162_v35, %v1158_v24 }
 0x167   :  { %103 = vperm.xlu1 %1149, %v98_v36  }
 0x168   :  { %560 = vperm.xlu0 %1150, %v100_v37  }
 0x1e6   :  { %v104_v43 = vpop.permute.xlu1 %103 }
 0x1e7   :  { %v561_v44 = vpop.permute.xlu0 %560  ;;  %v108_v45 = vrot.slane %v104_v43, %v73_v22 }
 0x1e8   :  { %v565_v46 = vrot.slane %v561_v44, %v73_v22 }
 0x1e9   :  { %v110_v47 = vsel %vm109_vm4, %v108_v45, 0 }
 0x1ea   :  { %v566_v49 = vsel %vm109_vm4, %v565_v46, 0  ;;  %v178_v50 = vand.u32 4294901760, %v110_v47 }
 0x1eb   :  { %v634_v52 = vand.u32 4294901760, %v566_v49 }
 0x1ec   :  { %v179_v53 = vsub.f32 %v110_v47, %v178_v50 }
 0x1ed   :  { %v635_v54 = vsub.f32 %v566_v49, %v634_v52 }
 0x1ee   :  { %v180_v56 = vand.u32 4294901760, %v179_v53 }
 0x1ef   :  { %v636_v58 = vand.u32 4294901760, %v635_v54 }
 0x1f0   :  { %v181_v59 = vsub.f32 %v179_v53, %v180_v56 }
 0x1f1   :  { %v637_v60 = vsub.f32 %v635_v54, %v636_v58 }
 0x1f2   :  { %v182_v62 = vand.u32 4294901760, %v181_v59 }
 0x1f3   :  { %v638_v0 = vand.u32 4294901760, %v637_v60 }
 0x1f4   :  { %1065 = vmatmul.mubr.f32.vlgmr.msra.gmra.mrb[0].mxu0 %v182_v62 }
 0x1f5   :  { %1095 = vmatmul.mubr.f32.vlgmr.msra.gmra.mrb[0].mxu1 %v638_v0  ;;  %1068 = vmatpush3.msra.mxu0 %v193_v61 }
 0x1f6   :  { %1098 = vmatpush3.msra.mxu1 %v649_v63  ;;  %1069 = vmatprep.mubr.msk.f32.mxu0 %vm1216_vm3, %v1215_v40 }
 0x1f7   :  { %1099 = vmatprep.mubr.msk.f32.mxu1 %vm1216_vm3, %v1215_v40  ;;  %1102 = vmatprep.subr.mxu1 %v1215_v40 }
 0x1f8   :  { %1072 = vmatprep.subr.mxu0 %v1215_v40 }
 0x1fc   :  { %1070 = vmatmul.mubr.f32.vlgmr.msra.gmra.mrb[0].mxu0 %v178_v50 }
 0x1fd   :  { %1100 = vmatmul.mubr.f32.vlgmr.msra.gmra.mrb[0].mxu1 %v634_v52  ;;  %1073 = vmatpush3.msra.mxu0 %v190_v41 }
 0x1fe   :  { %1103 = vmatpush3.msra.mxu1 %v646_v42  ;;  %1074 = vmatprep.mubr.msk.f32.mxu0 %vm1216_vm3, %v1215_v40 }
 0x1ff   :  { %1104 = vmatprep.mubr.msk.f32.mxu1 %vm1216_vm3, %v1215_v40  ;;  %1107 = vmatprep.subr.mxu1 %v1215_v40 }
 0x200   :  { %1077 = vmatprep.subr.mxu0 %v1215_v40 }
 0x204   :  { %1075 = vmatmul.mubr.f32.vlgmr.msra.gmra.mrb[0].mxu0 %v179_v53 }
 0x205   :  { %1105 = vmatmul.mubr.f32.vlgmr.msra.gmra.mrb[0].mxu1 %v635_v54  ;;  %1078 = vmatpush3.msra.mxu0 %v1261_v38 }
 0x206   :  { %1108 = vmatpush3.msra.mxu1 %v1263_v39  ;;  %1079 = vmatprep.mubr.msk.f32.mxu0 %vm1216_vm3, %v1215_v40 }
 0x207   :  { %1109 = vmatprep.mubr.msk.f32.mxu1 %vm1216_vm3, %v1215_v40  ;;  %1112 = vmatprep.subr.mxu1 %v1215_v40 }
 0x208   :  { %1082 = vmatprep.subr.mxu0 %v1215_v40 }
 0x20c   :  { %1080 = vmatmul.mubr.f32.vlgmr.msra.gmra.mrb[0].mxu0 %v180_v56 }
 0x20d   :  { %1110 = vmatmul.mubr.f32.vlgmr.msra.gmra.mrb[0].mxu1 %v636_v58  ;;  %1083 = vmatpush3.msra.mxu0 %v191_v48 }
 0x20e   :  { %1113 = vmatpush3.msra.mxu1 %v647_v51  ;;  %1084 = vmatprep.mubr.msk.f32.mxu0 %vm1216_vm3, %v1215_v40 }
 0x20f   :  { %1114 = vmatprep.mubr.msk.f32.mxu1 %vm1216_vm3, %v1215_v40  ;;  %1117 = vmatprep.subr.mxu1 %v1215_v40 }
 0x210   :  { %1087 = vmatprep.subr.mxu0 %v1215_v40 }
 0x214   :  { %1085 = vmatmul.mubr.f32.vlgmr.msra.gmra.mrb[0].mxu0 %v178_v50 }
 0x215   :  { %1115 = vmatmul.mubr.f32.vlgmr.msra.gmra.mrb[0].mxu1 %v634_v52  ;;  %1088 = vmatpush3.msra.mxu0 %v1261_v38 }
 0x216   :  { %1118 = vmatpush3.msra.mxu1 %v1263_v39  ;;  %1089 = vmatprep.mubr.msk.f32.mxu0 %vm1216_vm3, %v1215_v40 }
 0x217   :  { %1119 = vmatprep.mubr.msk.f32.mxu1 %vm1216_vm3, %v1215_v40 }
 0x21c   :  { %1090 = vmatmul.mubr.f32.vlgmr.msra.gmra.mrb[0].mxu0 %v178_v50 }
 0x21d   :  { %1120 = vmatmul.mubr.f32.vlgmr.msra.gmra.mrb[0].mxu1 %v634_v52 }
 0x2ef   :  { %v554_v1 = vpop.f32.mrb[0].mxu0 }
 0x2f0   :  { %v1010_v2 = vpop.f32.mrb[0].mxu1  ;;  %v1091_v3 = vpop.f32.mrb[1].mxu0 }
 0x2f1   :  { %v1016_v4 = vrot.slane %v1010_v2, 7  ;;  %v1121_v5 = vpop.f32.mrb[1].mxu1 }
 0x2f3   :  { %v1017_v6 = vsel %vm79_vm1, %v1016_v4, %v554_v1 }
 0x2f4   :  { %1020 = vst.msk [vmem:[#allocation6] sm:$0x3] %vm1019_vm5, %v1017_v6 }
 0x2f5   :  { %1196 = shalt.err (!%p1193_p12)
}
 0x2f6   :  { %s1197_s5 = scalar_lea.hbm %s1326_s3, 32 }
 0x2f7   :  { %p1198_p13 = scmp.ne.s32.totalorder %s1326_s3, %s1197_s5  ;;  %p1201_p0 = scmp.lt.u32.totalorder %s1197_s5, %s1326_s3 }
 0x2f9   :  { %p1203_p1 = pnand %p1201_p0, %p1198_p13 }
 0x2fb   :  { %1206 = shalt.err (!%p1203_p1)
}
 0x2fc   :  { %1030 = dma.vmem_to_hbm [thread:$0]  %s1028_s1, 32, %s1326_s3, [#allocation5]  }
 0x2fd   :  { %1209 = dma.done.wait [#allocation5], 32  }
 0x2fe   :  { %1210 = vsyncadd [#allocation5], 4294967264 }
 0x2ff   :  { %1034 = vsyncpa [#allocation4], 1 }
 0x300   :  { %1035 = vsyncpa [#allocation5], 1 }

</bundles_post_ra>
